<compile_context>
chip_gen: v5e
topology: v5e:2x2
jax: 0.10.0
libtpu: 0.0.40
codegen_flags: <defaults>
</compile_context>

<pallas_src>
import functools

import jax
import jax.numpy as jnp
from jax import lax
from jax.experimental import pallas as pl
from jax.experimental.pallas import tpu as pltpu


def _hash_bits_u32(seed_u32, shape):
    """Counter-based uint32 hash (splitmix-style) over a 2D index grid."""
    r = lax.broadcasted_iota(jnp.int32, shape, 0).astype(jnp.uint32)
    c = lax.broadcasted_iota(jnp.int32, shape, 1).astype(jnp.uint32)
    x = seed_u32 + r * jnp.uint32(0x9E3779B9) + c * jnp.uint32(0x85EBCA6B)
    x = x ^ (x >> 16)
    x = x * jnp.uint32(0x7FEB352D)
    x = x ^ (x >> 15)
    x = x * jnp.uint32(0x846CA68B)
    x = x ^ (x >> 16)
    return x


def _linear_transform_kernel(seed_ref, x_ref, w1_ref, b1_ref, w2_ref, b2_ref,
                             o_ref, *, apply_dropout: bool):
    # fc1: (TB, F)bf16 @ (F, H)bf16 -> f32 accumulation, bias add in f32.
    h = jnp.dot(x_ref[...], w1_ref[...], preferred_element_type=jnp.float32)
    h = h + b1_ref[...]                       # (1, H) broadcasts over rows

    if apply_dropout:
        # Dropout p=0.5 (training semantics): keep w.p. 0.5, scale kept by 2.
        # Per-grid-step seed offset so batch tiles get independent masks.
        # TODO(synk): random stream is a counter-based hash, not torch's RNG.
        seed = (seed_ref[0] + pl.program_id(0)).astype(jnp.uint32)
        bits = _hash_bits_u32(seed, h.shape)
        keep = bits < jnp.uint32(0x80000000)   # sign bit -> Bernoulli(0.5)
        h = jnp.where(keep, h + h, jnp.float32(0.0))

    # fc2: (TB, H)bf16 @ (H, O)bf16 -> f32 accumulation, bias add in f32.
    out = jnp.dot(h.astype(jnp.bfloat16), w2_ref[...],
                  preferred_element_type=jnp.float32)
    out = out + b2_ref[...]
    o_ref[...] = out.astype(o_ref.dtype)


def linear_transform_forward(x, w1, b1, w2, b2, seed, *, training=True,
                             block_b=None):
    """x: (B, F) f32; w1: (F, H); b1: (H,); w2: (H, O); b2: (O,)."""
    B, F = x.shape
    H = w1.shape[1]
    O = w2.shape[1]
    # Keep contraction / output dims lane-dense (multiples of 128).
    assert F % 128 == 0 and H % 128 == 0 and O % 128 == 0, \
        "F, H, O must be multiples of 128 (pad in caller otherwise)"

    # Batch tile: up to 256 rows (MXU depth on v6e/v7x), multiple of 8 sublanes.
    if block_b is None:
        block_b = min(256, max(8, B))
    block_b = max(8, (block_b // 8) * 8)

    pad = (-B) % block_b
    if pad:
        x = jnp.pad(x, ((0, pad), (0, 0)))
    Bp = B + pad
    nb = Bp // block_b

    # bf16 operands for the MXU (halves weight/input DMA bytes); f32 biases.
    x_bf = x.astype(jnp.bfloat16)
    w1_bf = w1.astype(jnp.bfloat16)
    w2_bf = w2.astype(jnp.bfloat16)
    b1_2d = b1.reshape(1, H).astype(jnp.float32)
    b2_2d = b2.reshape(1, O).astype(jnp.float32)
    seed_arr = jnp.asarray([seed], dtype=jnp.int32)

    kernel = functools.partial(_linear_transform_kernel,
                               apply_dropout=training)

    out = pl.pallas_call(
        kernel,
        out_shape=jax.ShapeDtypeStruct((Bp, O), jnp.float32),
        grid_spec=pltpu.PrefetchScalarGridSpec(
            num_scalar_prefetch=1,           # seed lands in SMEM
            grid=(nb,),                      # batch tiles
            in_specs=[
                pl.BlockSpec((block_b, F), lambda i, s: (i, 0)),  # x tile
                pl.BlockSpec((F, H), lambda i, s: (0, 0)),        # w1 resident
                pl.BlockSpec((1, H), lambda i, s: (0, 0)),        # b1 resident
                pl.BlockSpec((H, O), lambda i, s: (0, 0)),        # w2 resident
                pl.BlockSpec((1, O), lambda i, s: (0, 0)),        # b2 resident
            ],
            out_specs=pl.BlockSpec((block_b, O), lambda i, s: (i, 0)),
        ),
        compiler_params=pltpu.CompilerParams(
            dimension_semantics=("parallel",)),   # shard tiles across TCs (v7x)
        # TODO(synk): for large F/H/O (e.g. 2048+), add a K-reduction grid axis
        # with a VMEM f32 accumulator and set vmem_limit_bytes per generation
        # (v7x has only 64 MiB physical VMEM).
    )(seed_arr, x_bf, w1_bf, b1_2d, w2_bf, b2_2d)

    return out[:B] if pad else out


def init_params(key, fea_dim, hidden_dim, out_dim):
    """Matches weights_init for nn.Linear: weight ~ N(0, 0.01), bias = ones."""
    k1, k2 = jax.random.split(key)
    # torch stores weight as (out, in); we keep the transposed (in, out) layout.
    w1 = (jax.random.normal(k1, (hidden_dim, fea_dim), jnp.float32) * 0.01).T
    b1 = jnp.ones((hidden_dim,), jnp.float32)
    w2 = (jax.random.normal(k2, (out_dim, hidden_dim), jnp.float32) * 0.01).T
    b2 = jnp.ones((out_dim,), jnp.float32)
    return w1, b1, w2, b2


if __name__ == "__main__":
    # Small shapes consistent with the module (fea_dim -> hidden_dim -> out_dim).
    B, FEA, HID, OUT = 8, 128, 256, 128

    key = jax.random.PRNGKey(0)
    kx, kp = jax.random.split(key)
    x = jax.random.normal(kx, (B, FEA), jnp.float32)
    w1, b1, w2, b2 = init_params(kp, FEA, HID, OUT)

    # Training mode (dropout active, as in the module's forward).
    out_train = linear_transform_forward(x, w1, b1, w2, b2, seed=0,
                                         training=True)
    out_train = jax.block_until_ready(out_train)
    assert out_train.shape == (B, OUT)
    assert bool(jnp.all(jnp.isfinite(out_train)))

    # Eval mode (dropout = identity) checked against a pure-JAX reference that
    # uses the same bf16-operand / f32-accumulate recipe.
    out_eval = linear_transform_forward(x, w1, b1, w2, b2, seed=0,
                                        training=False)
    out_eval = jax.block_until_ready(out_eval)
    h_ref = jnp.dot(x.astype(jnp.bfloat16), w1.astype(jnp.bfloat16),
                    preferred_element_type=jnp.float32) + b1
    ref_eval = jnp.dot(h_ref.astype(jnp.bfloat16), w2.astype(jnp.bfloat16),
                       preferred_element_type=jnp.float32) + b2
    assert jnp.allclose(out_eval, ref_eval, atol=1e-3, rtol=1e-3)

    print("KERNEL_OK")
</pallas_src>

<mosaic_0001>
module attributes {stable_mosaic.version = 11 : i64} {
  func.func @_linear_transform_kernel(%arg0: i32, %arg1: memref<1xi32, #tpu.memory_space<smem>>, %arg2: memref<8x128xbf16, #tpu.memory_space<vmem>>, %arg3: memref<128x256xbf16, #tpu.memory_space<vmem>>, %arg4: memref<1x256xf32, #tpu.memory_space<vmem>>, %arg5: memref<256x128xbf16, #tpu.memory_space<vmem>>, %arg6: memref<1x128xf32, #tpu.memory_space<vmem>>, %arg7: memref<8x128xf32, #tpu.memory_space<vmem>>) attributes {dimension_semantics = [#tpu.dimension_semantics<parallel>], iteration_bounds = array<i64: 1>, scalar_prefetch = 1 : i64, scratch_operands = 0 : i64, tpu.core_type = #tpu.core_type<tc>, window_params = [{transform_indices = @transform_0, window_bounds = array<i64: 8, 128>}, {pipeline_mode = #tpu.pipeline_mode<synchronous>, transform_indices = @transform_1, window_bounds = array<i64: 128, 256>}, {pipeline_mode = #tpu.pipeline_mode<synchronous>, transform_indices = @transform_2, window_bounds = array<i64: 1, 256>}, {pipeline_mode = #tpu.pipeline_mode<synchronous>, transform_indices = @transform_3, window_bounds = array<i64: 256, 128>}, {pipeline_mode = #tpu.pipeline_mode<synchronous>, transform_indices = @transform_4, window_bounds = array<i64: 1, 128>}, {transform_indices = @transform_5, window_bounds = array<i64: 8, 128>}]} {
    %c0 = arith.constant 0 : index
    %c0_0 = arith.constant 0 : index
    %0 = vector.load %arg2[%c0, %c0_0] : memref<8x128xbf16, #tpu.memory_space<vmem>>, vector<8x128xbf16>
    %c0_1 = arith.constant 0 : index
    %c0_2 = arith.constant 0 : index
    %1 = vector.load %arg3[%c0_1, %c0_2] : memref<128x256xbf16, #tpu.memory_space<vmem>>, vector<128x256xbf16>
    %cst = arith.constant dense<0.000000e+00> : vector<8x256xf32>
    %2 = tpu.matmul %0, %1, %cst {dimension_numbers = #tpu.dot_dimension_numbers<[1], [0], [0], [1], [0, 0, 1, 1], [], []>} : vector<8x128xbf16>, vector<128x256xbf16>, vector<8x256xf32> -> vector<8x256xf32>
    %c0_3 = arith.constant 0 : index
    %c0_4 = arith.constant 0 : index
    %3 = vector.load %arg4[%c0_3, %c0_4] : memref<1x256xf32, #tpu.memory_space<vmem>>, vector<1x256xf32>
    %4 = vector.broadcast %3 : vector<1x256xf32> to vector<8x256xf32>
    %5 = arith.addf %2, %4 : vector<8x256xf32>
    %c0_5 = arith.constant 0 : index
    %6 = memref.load %arg1[%c0_5] : memref<1xi32, #tpu.memory_space<smem>>
    %7 = arith.addi %6, %arg0 : i32
    %8 = tpu.iota {dimensions = array<i32: 0>} : vector<8x256xi32>
    %9 = tpu.iota {dimensions = array<i32: 1>} : vector<8x256xi32>
    %c-1640531527_i32 = arith.constant -1640531527 : i32
    %10 = vector.broadcast %c-1640531527_i32 : i32 to vector<8x256xi32>
    %11 = arith.muli %8, %10 : vector<8x256xi32>
    %12 = vector.broadcast %7 : i32 to vector<8x256xi32>
    %13 = arith.addi %12, %11 : vector<8x256xi32>
    %c-2048144789_i32 = arith.constant -2048144789 : i32
    %14 = vector.broadcast %c-2048144789_i32 : i32 to vector<8x256xi32>
    %15 = arith.muli %9, %14 : vector<8x256xi32>
    %16 = arith.addi %13, %15 : vector<8x256xi32>
    %c16_i32 = arith.constant 16 : i32
    %17 = vector.broadcast %c16_i32 : i32 to vector<8x256xi32>
    %18 = arith.shrui %16, %17 : vector<8x256xi32>
    %19 = arith.xori %16, %18 : vector<8x256xi32>
    %c2146121005_i32 = arith.constant 2146121005 : i32
    %20 = vector.broadcast %c2146121005_i32 : i32 to vector<8x256xi32>
    %21 = arith.muli %19, %20 : vector<8x256xi32>
    %c15_i32 = arith.constant 15 : i32
    %22 = vector.broadcast %c15_i32 : i32 to vector<8x256xi32>
    %23 = arith.shrui %21, %22 : vector<8x256xi32>
    %24 = arith.xori %21, %23 : vector<8x256xi32>
    %c-2073254261_i32 = arith.constant -2073254261 : i32
    %25 = vector.broadcast %c-2073254261_i32 : i32 to vector<8x256xi32>
    %26 = arith.muli %24, %25 : vector<8x256xi32>
    %c16_i32_6 = arith.constant 16 : i32
    %27 = vector.broadcast %c16_i32_6 : i32 to vector<8x256xi32>
    %28 = arith.shrui %26, %27 : vector<8x256xi32>
    %29 = arith.xori %26, %28 : vector<8x256xi32>
    %c-2147483648_i32 = arith.constant -2147483648 : i32
    %30 = vector.broadcast %c-2147483648_i32 : i32 to vector<8x256xi32>
    %31 = arith.cmpi ult, %29, %30 : vector<8x256xi32>
    %32 = arith.addf %5, %5 : vector<8x256xf32>
    %cst_7 = arith.constant 0.000000e+00 : f32
    %33 = vector.broadcast %cst_7 : f32 to vector<8x256xf32>
    %34 = arith.select %31, %32, %33 : vector<8x256xi1>, vector<8x256xf32>
    %35 = arith.truncf %34 : vector<8x256xf32> to vector<8x256xbf16>
    %c0_8 = arith.constant 0 : index
    %c0_9 = arith.constant 0 : index
    %36 = vector.load %arg5[%c0_8, %c0_9] : memref<256x128xbf16, #tpu.memory_space<vmem>>, vector<256x128xbf16>
    %cst_10 = arith.constant dense<0.000000e+00> : vector<8x128xf32>
    %37 = tpu.matmul %35, %36, %cst_10 {dimension_numbers = #tpu.dot_dimension_numbers<[1], [0], [0], [1], [0, 0, 1, 1], [], []>} : vector<8x256xbf16>, vector<256x128xbf16>, vector<8x128xf32> -> vector<8x128xf32>
    %c0_11 = arith.constant 0 : index
    %c0_12 = arith.constant 0 : index
    %38 = vector.load %arg6[%c0_11, %c0_12] : memref<1x128xf32, #tpu.memory_space<vmem>>, vector<1x128xf32>
    %39 = vector.broadcast %38 : vector<1x128xf32> to vector<8x128xf32>
    %40 = arith.addf %37, %39 : vector<8x128xf32>
    %c0_13 = arith.constant 0 : index
    %c0_14 = arith.constant 0 : index
    %41 = vector.load %arg7[%c0_13, %c0_14] : memref<8x128xf32, #tpu.memory_space<vmem>>, vector<8x128xf32>
    tpu.vector_store %arg7[%c0_13, %c0_14], %40 {strides = array<i32>} : memref<8x128xf32, #tpu.memory_space<vmem>>, vector<8x128xf32>,
    return
  }
  func.func @transform_0(%arg0: i32, %arg1: memref<1xi32, #tpu.memory_space<smem>>) -> (i32, i32) {
    %c0_i32 = arith.constant 0 : i32
    %c0_i32_0 = arith.constant 0 : i32
    return %arg0, %c0_i32 : i32, i32
  }
  func.func @transform_1(%arg0: i32, %arg1: memref<1xi32, #tpu.memory_space<smem>>) -> (i32, i32) {
    %c0_i32 = arith.constant 0 : i32
    %c0_i32_0 = arith.constant 0 : i32
    %c0_i32_1 = arith.constant 0 : i32
    return %c0_i32, %c0_i32_0 : i32, i32
  }
  func.func @transform_2(%arg0: i32, %arg1: memref<1xi32, #tpu.memory_space<smem>>) -> (i32, i32) {
    %c0_i32 = arith.constant 0 : i32
    %c0_i32_0 = arith.constant 0 : i32
    %c0_i32_1 = arith.constant 0 : i32
    return %c0_i32, %c0_i32_0 : i32, i32
  }
  func.func @transform_3(%arg0: i32, %arg1: memref<1xi32, #tpu.memory_space<smem>>) -> (i32, i32) {
    %c0_i32 = arith.constant 0 : i32
    %c0_i32_0 = arith.constant 0 : i32
    %c0_i32_1 = arith.constant 0 : i32
    return %c0_i32, %c0_i32_0 : i32, i32
  }
  func.func @transform_4(%arg0: i32, %arg1: memref<1xi32, #tpu.memory_space<smem>>) -> (i32, i32) {
    %c0_i32 = arith.constant 0 : i32
    %c0_i32_0 = arith.constant 0 : i32
    %c0_i32_1 = arith.constant 0 : i32
    return %c0_i32, %c0_i32_0 : i32, i32
  }
  func.func @transform_5(%arg0: i32, %arg1: memref<1xi32, #tpu.memory_space<smem>>) -> (i32, i32) {
    %c0_i32 = arith.constant 0 : i32
    %c0_i32_0 = arith.constant 0 : i32
    return %arg0, %c0_i32 : i32, i32
  }
}

</mosaic_0001>

<bundles_post_ra>
// kernel: tpu_custom_call.1
= control target key start
LH: loop header
LB: loop body
LE: loop exit
PB: predicated region body
PF: predicated region fallthrough
CT: control target
= control target key end

     0   :  { %12 = vsyncpa [#allocation5], 0  ;;  %s759_s0 = inlined_call_operand.<no memory space> [shape: s32[1], index: 0, kind: input, shape index: {}]   ;;  %s760_s1 = inlined_call_operand.hbm [shape: bf16[8,128], index: 1, kind: input, shape index: {}]   ;;  %s761_s2 = inlined_call_operand.hbm [shape: bf16[128,256], index: 2, kind: input, shape index: {}]   ;;  %s762_s3 = inlined_call_operand.vmem [shape: f32[1,256], index: 3, kind: input, shape index: {}]   ;;  %s763_s4 = inlined_call_operand.hbm [shape: bf16[256,128], index: 4, kind: input, shape index: {}]   ;;  %s764_s5 = inlined_call_operand.vmem [shape: f32[1,128], index: 5, kind: input, shape index: {}]   ;;  %s765_s6 = inlined_call_operand.hbm [shape: f32[8,128], index: 6, kind: output, shape index: {}]  }
   0x1   :  { %13 = vsyncpa [#allocation8], 0  ;;  %s30_s23 = sshll.u32 %s761_s2, 4  ;;  %s31_s23 = int_to_ptr.hbm [resolvable:$true] %s30_s23 }
   0x2   :  { %14 = vsyncpa [#allocation6], 0  ;;  %s695_s24 = smov [#allocation7]   ;;  %s20_s28 = sshll.u32 %s760_s1, 4  ;;  %s21_s28 = int_to_ptr.hbm [resolvable:$true] %s20_s28 }
   0x3   :  { %s32_s25 = sshll.u32 %s695_s24, 4  ;;  %s696_s29 = smov 128   ;;  %s33_s25 = int_to_ptr.vmem [resolvable:$true] %s32_s25 }
   0x4   :  { %s697_s30 = smov 8   ;;  %s698_s7 = smov [#allocation4]  }
   0x5   :  { %38 = dma.hbm_to_vmem [thread:$0]  %s31_s23, 2048, %s33_s25, [#allocation8], %s696_s29, %s696_s29, %s697_s30  }
   0x6   :  { %s22_s8 = sshll.u32 %s698_s7, 4  ;;  %s45_s11 = sshll.u32 %s763_s4, 4  ;;  %s23_s8 = int_to_ptr.vmem [resolvable:$true] %s22_s8  ;;  %s46_s11 = int_to_ptr.hbm [resolvable:$true] %s45_s11 }
   0x7   :  { %25 = dma.hbm_to_vmem [thread:$0]  %s21_s28, 64, %s23_s8, [#allocation5]  }
   0x8   :  { %s699_s2 = smov [#allocation9]   ;;  %s700_s13 = smov 64  }
   0x9   :  { %s47_s12 = sshll.u32 %s699_s2, 4  ;;  %s701_s14 = smov 4   ;;  %s48_s12 = int_to_ptr.vmem [resolvable:$true] %s47_s12 }
   0xa   :  { %53 = dma.hbm_to_vmem [thread:$0]  %s46_s11, 2048, %s48_s12, [#allocation8], %s700_s13, %s700_s13, %s701_s14  }
   0xb   :  { %689 = dma.done.wait [#allocation5], 64  }
   0xc   :  { %690 = vsyncadd [#allocation5], 4294967232 }
   0xd   :  { %691 = dma.done.wait [#allocation8], 4096  }
   0xe   :  { %692 = vsyncadd [#allocation8], 4294963200  ;;  %v474_v0 = vld [vmem:[#allocation7 + $0x70] sm:$0xf]  ;;  %v567_v1 = vld [vmem:[#allocation7 + $0x74] sm:$0xf0]  ;;  %v199_v61 = vlaneseq }
   0xf   :  { %v566_v2 = vld [vmem:[#allocation7 + $0x74] sm:$0xf]  ;;  %v475_v3 = vor.u32 %v567_v1, %v474_v0  ;;  %v476_v4 = vld [vmem:[#allocation7 + $0x78] sm:$0xf0]  ;;  %v466_v5 = vld [vmem:[#allocation7 + $0x60] sm:$0xf]  ;;  %v205_v1 = vstv %s759_s0 }
  0x10   :  { %v565_v6 = vld [vmem:[#allocation7 + $0x64] sm:$0xf0]  ;;  %v479_v7 = vor.u32 %v566_v2, %v476_v4  ;;  %v564_v8 = vld [vmem:[#allocation7 + $0x64] sm:$0xf]  ;;  %v468_v9 = vld [vmem:[#allocation7 + $0x68] sm:$0xf0] }
  0x11   :  { %171 = vmatpush.bf16.msra.mxu0 %v475_v3  ;;  %v467_v10 = vor.u32 %v565_v6, %v466_v5  ;;  %v471_v11 = vor.u32 %v564_v8, %v468_v9  ;;  %v458_v12 = vld [vmem:[#allocation7 + $0x50] sm:$0xf]  ;;  %v563_v13 = vld [vmem:[#allocation7 + $0x54] sm:$0xf0]  ;;  %v562_v14 = vld [vmem:[#allocation7 + $0x54] sm:$0xf] }
  0x12   :  { %184 = vmatpush.bf16.msra.mxu1 %v479_v7  ;;  %v460_v15 = vld [vmem:[#allocation7 + $0x58] sm:$0xf0]  ;;  %v459_v16 = vor.u32 %v563_v13, %v458_v12  ;;  %v450_v18 = vld [vmem:[#allocation7 + $0x40] sm:$0xf]  ;;  %v561_v19 = vld [vmem:[#allocation7 + $0x44] sm:$0xf0] }
  0x13   :  { %v463_v17 = vor.u32 %v562_v14, %v460_v15  ;;  %v560_v20 = vld [vmem:[#allocation7 + $0x44] sm:$0xf]  ;;  %v452_v21 = vld [vmem:[#allocation7 + $0x48] sm:$0xf0]  ;;  %v451_v22 = vor.u32 %v561_v19, %v450_v18  ;;  %v575_v23 = vld [vmem:[#allocation9 + $0x38] sm:$0xff]  ;;  %v200_v62 = vshrl.u32 %v199_v61, 7 }
  0x14   :  { %v583_v24 = vld [vmem:[#allocation9 + $0x78] sm:$0xff]  ;;  %v455_v25 = vor.u32 %v560_v20, %v452_v21  ;;  %v442_v26 = vld [vmem:[#allocation7 + $0x30] sm:$0xf]  ;;  %v558_v28 = vld [vmem:[#allocation7 + $0x34] sm:$0xf]  ;;  %371 = vmatpush.bf16.msra.mxu2 %v575_v23  ;;  %v202_v63 = vand.u32 127, %v199_v61 }
  0x15   :  { %172 = vmatpush.bf16.msra.mxu0 %v467_v10  ;;  %v559_v27 = vld [vmem:[#allocation7 + $0x34] sm:$0xf0]  ;;  %v444_v29 = vld [vmem:[#allocation7 + $0x38] sm:$0xf0]  ;;  %384 = vmatpush.bf16.msra.mxu3 %v583_v24  ;;  %v574_v30 = vld [vmem:[#allocation9 + $0x30] sm:$0xff]  ;;  %s702_s17 = smov [#allocation10]  }
  0x16   :  { %185 = vmatpush.bf16.msra.mxu1 %v471_v11  ;;  %v582_v31 = vld [vmem:[#allocation9 + $0x70] sm:$0xff]  ;;  %v443_v32 = vor.u32 %v559_v27, %v442_v26  ;;  %v447_v33 = vor.u32 %v558_v28, %v444_v29  ;;  %v434_v34 = vld [vmem:[#allocation7 + $0x20] sm:$0xf]  ;;  %v557_v35 = vld [vmem:[#allocation7 + $0x24] sm:$0xf0]  ;;  %v203_v2 = vadd.s32 128, %v202_v63 }
  0x17   :  { %v556_v36 = vld [vmem:[#allocation7 + $0x24] sm:$0xf]  ;;  %v436_v37 = vld [vmem:[#allocation7 + $0x28] sm:$0xf0]  ;;  %v435_v40 = vor.u32 %v557_v35, %v434_v34  ;;  %v426_v42 = vld [vmem:[#allocation7 + $0x10] sm:$0xf] }
  0x18   :  { %372 = vmatpush.bf16.msra.mxu2 %v574_v30  ;;  %v573_v38 = vld [vmem:[#allocation9 + $0x28] sm:$0xff]  ;;  %v439_v41 = vor.u32 %v556_v36, %v436_v37  ;;  %v555_v43 = vld [vmem:[#allocation7 + $0x14] sm:$0xf0]  ;;  %v554_v44 = vld [vmem:[#allocation7 + $0x14] sm:$0xf]  ;;  %s403_s18 = sshll.u32 %s702_s17, 4  ;;  %s404_s18 = int_to_ptr.vmem [resolvable:$true] %s403_s18 }
  0x19   :  { %173 = vmatpush.bf16.msra.mxu0 %v459_v16  ;;  %385 = vmatpush.bf16.msra.mxu3 %v582_v31  ;;  %v581_v39 = vld [vmem:[#allocation9 + $0x68] sm:$0xff]  ;;  %v428_v45 = vld [vmem:[#allocation7 + $0x18] sm:$0xf0]  ;;  %v572_v46 = vld [vmem:[#allocation9 + $0x20] sm:$0xff]  ;;  %v427_v48 = vor.u32 %v555_v43, %v426_v42  ;;  %v204_v0 = vmul.u32 2654435769, %v200_v62 }
  0x1a   :  { %186 = vmatpush.bf16.msra.mxu1 %v463_v17  ;;  %v580_v47 = vld [vmem:[#allocation9 + $0x60] sm:$0xff]  ;;  %v431_v49 = vor.u32 %v554_v44, %v428_v45  ;;  %v553_v51 = vld [vmem:[#allocation7 + $0x4] sm:$0xf0]  ;;  %v420_v53 = vld [vmem:[#allocation7 + $0x8] sm:$0xf0]  ;;  %s405_s21 = sshll.u32 %s765_s6, 4  ;;  %s406_s21 = int_to_ptr.hbm [resolvable:$true] %s405_s21 }
  0x1b   :  { %v418_v50 = vld [vmem:[#allocation7] sm:$0xf]  ;;  %v552_v52 = vld [vmem:[#allocation7 + $0x4] sm:$0xf]  ;;  %v571_v54 = vld [vmem:[#allocation9 + $0x18] sm:$0xff]  ;;  %v206_v3 = vadd.s32 %v205_v1, %v204_v0 }
  0x1c   :  { %373 = vmatpush.bf16.msra.mxu2 %v573_v38  ;;  %v579_v55 = vld [vmem:[#allocation9 + $0x58] sm:$0xff]  ;;  %v419_v56 = vor.u32 %v553_v51, %v418_v50  ;;  %v423_v57 = vor.u32 %v552_v52, %v420_v53  ;;  %v570_v58 = vld [vmem:[#allocation9 + $0x10] sm:$0xff]  ;;  %v207_v4 = vmul.u32 2246822507, %v202_v63  ;;  %v208_v5 = vmul.u32 2246822507, %v203_v2 }
  0x1d   :  { %174 = vmatpush.bf16.msra.mxu0 %v451_v22  ;;  %386 = vmatpush.bf16.msra.mxu3 %v581_v39  ;;  %v578_v59 = vld [vmem:[#allocation9 + $0x50] sm:$0xff]  ;;  %v68_v60 = vld [vmem:[#allocation4] sm:$0xf]  ;;  %v569_v10 = vld [vmem:[#allocation9 + $0x8] sm:$0xff] }
  0x1e   :  { %187 = vmatpush.bf16.msra.mxu1 %v455_v25  ;;  %v209_v6 = vadd.s32 %v207_v4, %v206_v3  ;;  %v210_v7 = vadd.s32 %v208_v5, %v206_v3  ;;  %v577_v11 = vld [vmem:[#allocation9 + $0x48] sm:$0xff]  ;;  %v568_v14 = vld [vmem:[#allocation9] sm:$0xff]  ;;  %v85_v27 = vld [vmem:[%s762_s3] sm:$0x3] }
  0x1f   :  { %v576_v15 = vld [vmem:[#allocation9 + $0x40] sm:$0xff]  ;;  %v87_v29 = vperm.slane %v85_v27, 0  ;;  %v88_v31 = vperm.slane %v85_v27, 1  ;;  %v592_v43 = vld [vmem:[%s764_s5] ss:$0 sm:$0xff] }
  0x20   :  { %374 = vmatpush.bf16.msra.mxu2 %v572_v46  ;;  %v211_v8 = vshrl.u32 %v209_v6, 16  ;;  %v212_v9 = vshrl.u32 %v210_v7, 16 }
  0x21   :  { %175 = vmatpush.bf16.msra.mxu0 %v443_v32  ;;  %387 = vmatpush.bf16.msra.mxu3 %v580_v47 }
  0x22   :  { %188 = vmatpush.bf16.msra.mxu1 %v447_v33  ;;  %v213_v12 = vxor.u32 %v211_v8, %v209_v6  ;;  %v214_v13 = vxor.u32 %v212_v9, %v210_v7 }
  0x24   :  { %375 = vmatpush.bf16.msra.mxu2 %v571_v54  ;;  %v215_v16 = vmul.u32 2146121005, %v213_v12  ;;  %v216_v17 = vmul.u32 2146121005, %v214_v13 }
  0x25   :  { %176 = vmatpush.bf16.msra.mxu0 %v435_v40  ;;  %388 = vmatpush.bf16.msra.mxu3 %v579_v55 }
  0x26   :  { %189 = vmatpush.bf16.msra.mxu1 %v439_v41  ;;  %v217_v18 = vshrl.u32 %v215_v16, 15  ;;  %v218_v19 = vshrl.u32 %v216_v17, 15 }
  0x28   :  { %376 = vmatpush.bf16.msra.mxu2 %v570_v58  ;;  %v219_v20 = vxor.u32 %v217_v18, %v215_v16  ;;  %v220_v21 = vxor.u32 %v218_v19, %v216_v17 }
  0x29   :  { %177 = vmatpush.bf16.msra.mxu0 %v427_v48  ;;  %389 = vmatpush.bf16.msra.mxu3 %v578_v59 }
  0x2a   :  { %190 = vmatpush.bf16.msra.mxu1 %v431_v49  ;;  %v221_v22 = vmul.u32 2221713035, %v219_v20  ;;  %v222_v23 = vmul.u32 2221713035, %v220_v21 }
  0x2c   :  { %377 = vmatpush.bf16.msra.mxu2 %v569_v10  ;;  %v223_v24 = vshrl.u32 %v221_v22, 16  ;;  %v224_v25 = vshrl.u32 %v222_v23, 16 }
  0x2d   :  { %178 = vmatpush.bf16.msra.mxu0 %v419_v56  ;;  %390 = vmatpush.bf16.msra.mxu3 %v577_v11 }
  0x2e   :  { %191 = vmatpush.bf16.msra.mxu1 %v423_v57  ;;  %v225_v26 = vxor.u32 %v223_v24, %v221_v22  ;;  %v226_v28 = vxor.u32 %v224_v25, %v222_v23 }
  0x30   :  { %179 = vmatmul.bf16.vlgmr.msra.gmra.mxu0 %v68_v60  ;;  %378 = vmatpush.bf16.msra.mxu2 %v568_v14  ;;  %v480_v30 = vxor.u32 2147483648, %v225_v26  ;;  %v481_v32 = vxor.u32 2147483648, %v226_v28 }
  0x31   :  { %192 = vmatmul.bf16.vlgmr.msra.gmra.mxu1 %v68_v60  ;;  %391 = vmatpush.bf16.msra.mxu3 %v576_v15 }
  0x32   :  { %vm229_vm0 = vcmp.lt.s32.totalorder %v480_v30, 0  ;;  %vm232_vm1 = vcmp.lt.s32.totalorder %v481_v32, 0 }
  0x33   :  { %vm546_vm2 = vmpackc.low %vm229_vm0, %vm229_vm0 }
  0x34   :  { %vm549_vm3 = vmpackc.low %vm232_vm1, %vm232_vm1 }
  0xad   :  { %v180_v33 = vpop.f32.mrf.mxu0 }
  0xae   :  { %v181_v34 = vadd.f32 %v180_v33, %v87_v29  ;;  %v193_v35 = vpop.f32.mrf.mxu1 }
  0xaf   :  { %v194_v36 = vadd.f32 %v193_v35, %v88_v31 }
  0xb0   :  { %v233_v37 = vadd.f32 %v181_v34, %v181_v34 }
  0xb1   :  { %v234_v38 = vadd.f32 %v194_v36, %v194_v36 }
  0xb2   :  { %v547_v39 = vpack.c.bf16 %v233_v37, %v233_v37 }
  0xb3   :  { %v550_v40 = vpack.c.bf16 %v234_v38, %v234_v38 }
  0xb4   :  { %548 = vmatmul.msk.bf16.vlgmr.msra.gmra.mxu2 %vm546_vm2, %v547_v39 }
  0xb5   :  { %551 = vmatmul.msk.bf16.vlgmr.msra.gmra.mxu3 %vm549_vm3, %v550_v40  ;;  %v182_v41 = vpop.f32.mrf.mxu0 }
  0xb6   :  { %v195_v42 = vpop.f32.mrf.mxu1 }
 0x137   :  { %v380_v44 = vpop.f32.mrf.mxu2 }
 0x138   :  { %v381_v45 = vadd.f32 %v592_v43, %v380_v44  ;;  %v393_v46 = vpop.f32.mrf.mxu3 }
 0x13a   :  { %v394_v47 = vadd.f32 %v393_v46, %v381_v45 }
 0x13c   :  { %397 = vst [vmem:[#allocation10] sm:$0xff] %v394_v47 }
 0x13d   :  { %408 = dma.vmem_to_hbm [thread:$0]  %s404_s18, 128, %s406_s21, [#allocation6]  }
 0x13f   :  { %v382_v48 = vpop.f32.mrf.mxu2 }
 0x140   :  { %v395_v49 = vpop.f32.mrf.mxu3 }
 0x141   :  { %693 = dma.done.wait [#allocation6], 128  }
 0x142   :  { %694 = vsyncadd [#allocation6], 4294967168 }
 0x143   :  { %413 = vsyncpa [#allocation5], 1 }
 0x144   :  { %414 = vsyncpa [#allocation8], 1 }
 0x145   :  { %415 = vsyncpa [#allocation6], 1 }

</bundles_post_ra>
